<compile_context>
chip_gen: v6e
topology: v6e:2x2x1
jax: 0.10.0
libtpu: 0.0.40
codegen_flags: <defaults>
</compile_context>

<pallas_src>
import functools

import jax
import jax.numpy as jnp
from jax.experimental import pallas as pl
from jax.experimental.pallas import tpu as pltpu


def se_weight_kernel(x_ref, w1_ref, b1_ref, w2_ref, b2_ref, o_ref, acc_ref, *,
                     inv_hw, hw, last_hw_start, needs_hw_mask):
    # x_ref:  [TN, C, THW]   w1_ref: [C, Cr]   b1_ref: [1, Cr]
    # w2_ref: [Cr, C]        b2_ref: [1, C]    o_ref:  [TN, C]   acc_ref: [TN, C] f32
    k = pl.program_id(1)
    nk = pl.num_programs(1)

    @pl.when(k == 0)
    def _init():
        acc_ref[...] = jnp.zeros_like(acc_ref)

    if needs_hw_mask:
        # Full tiles: plain streaming partial-sum (f32 accumulation).
        @pl.when(k < nk - 1)
        def _full_tiles():
            acc_ref[...] += jnp.sum(x_ref[...], axis=-1, dtype=jnp.float32)

        # Ragged last tile: zero out the out-of-bounds lanes before summing.
        @pl.when(k == nk - 1)
        def _ragged_tail():
            x = x_ref[...]
            lane = jax.lax.broadcasted_iota(jnp.int32, x.shape, 2) + last_hw_start
            x = jnp.where(lane < hw, x, jnp.zeros_like(x))
            acc_ref[...] += jnp.sum(x, axis=-1, dtype=jnp.float32)
    else:
        acc_ref[...] += jnp.sum(x_ref[...], axis=-1, dtype=jnp.float32)

    @pl.when(k == nk - 1)
    def _epilogue():
        pooled = acc_ref[...] * inv_hw                                   # true spatial mean
        h = jnp.dot(pooled, w1_ref[...], preferred_element_type=jnp.float32) + b1_ref[...]
        h = jnp.maximum(h, 0.0)                                          # ReLU
        y = jnp.dot(h, w2_ref[...], preferred_element_type=jnp.float32) + b2_ref[...]
        o_ref[...] = jax.nn.sigmoid(y).astype(o_ref.dtype)               # sigmoid SE weights


def _choose_thw(hw, tn, c, itemsize, budget_bytes):
    """Largest spatial tile (multiple of 128, or the full extent) fitting the budget."""
    max_elems = max(budget_bytes // max(tn * c * itemsize, 1), 128)
    if hw <= max_elems:
        return hw                        # full-extent block is always layout-legal
    return max((max_elems // 128) * 128, 128)


def se_weight_module(x, w1, b1, w2, b2, *, tn=None, thw=None,
                     x_tile_budget_bytes=6 << 20):
    """x: [N, C, H, W]; w1: [Cr, C] (fc1 1x1-conv weight squeezed); b1: [Cr];
    w2: [C, Cr]; b2: [C]. Returns [N, C, 1, 1] sigmoid SE weights."""
    N, C, H, W = x.shape
    HW = H * W
    Cr = w1.shape[0]
    itemsize = jnp.dtype(x.dtype).itemsize

    # ---- tile sizing ----
    # tn = min(N, 8): either equals the full N dim or is a multiple of 8 -> layout-legal.
    if tn is None:
        tn = min(N, 8)
    if thw is None:
        thw = _choose_thw(HW, tn, C, itemsize, x_tile_budget_bytes)

    x_flat = x.reshape(N, C, HW)          # contiguous reshape: no HBM copy, no padding

    w1_t = jnp.transpose(w1)              # [C, Cr]
    w2_t = jnp.transpose(w2)              # [Cr, C]
    b1_2d = b1.reshape(1, Cr)
    b2_2d = b2.reshape(1, C)

    n_steps = pl.cdiv(N, tn)
    hw_steps = pl.cdiv(HW, thw)
    needs_hw_mask = (HW % thw) != 0

    # ---- explicit VMEM budget (double-buffered inputs + resident params + acc) ----
    x_tile_bytes = tn * C * thw * itemsize
    param_bytes = (C * Cr + Cr + Cr * C + C) * itemsize
    out_tile_bytes = tn * C * itemsize
    acc_bytes = tn * C * 4
    vmem_needed = 2 * (x_tile_bytes + param_bytes + out_tile_bytes) + acc_bytes
    vmem_limit = int(min(max(vmem_needed + (4 << 20), 8 << 20), 40 << 20))

    kernel = functools.partial(
        se_weight_kernel,
        inv_hw=float(1.0 / HW),           # TRUE H*W: ragged tails never bias the mean
        hw=HW,
        last_hw_start=(hw_steps - 1) * thw,
        needs_hw_mask=needs_hw_mask,
    )

    grid_spec = pltpu.PrefetchScalarGridSpec(
        num_scalar_prefetch=0,
        grid=(n_steps, hw_steps),                                 # reduction axis last
        in_specs=[
            pl.BlockSpec((tn, C, thw), lambda i, k: (i, 0, k)),   # streamed x tiles
            pl.BlockSpec((C, Cr), lambda i, k: (0, 0)),           # resident params
            pl.BlockSpec((1, Cr), lambda i, k: (0, 0)),
            pl.BlockSpec((Cr, C), lambda i, k: (0, 0)),
            pl.BlockSpec((1, C), lambda i, k: (0, 0)),
        ],
        out_specs=pl.BlockSpec((tn, C), lambda i, k: (i, 0)),     # resident across reduction
        scratch_shapes=[pltpu.VMEM((tn, C), jnp.float32)],        # pooled-sum accumulator
    )

    out = pl.pallas_call(
        kernel,
        out_shape=jax.ShapeDtypeStruct((N, C), x.dtype),
        grid_spec=grid_spec,
        compiler_params=pltpu.CompilerParams(
            dimension_semantics=("parallel", "arbitrary"),
            vmem_limit_bytes=vmem_limit,
        ),
    )(x_flat, w1_t, b1_2d, w2_t, b2_2d)

    return out.reshape(N, C, 1, 1)


def se_weight_ref(x, w1, b1, w2, b2):
    """Pure-JAX reference for correctness check."""
    pooled = jnp.mean(x, axis=(2, 3))                 # [N, C]
    h = jnp.maximum(pooled @ w1.T + b1, 0.0)          # [N, Cr]
    y = h @ w2.T + b2                                 # [N, C]
    return jax.nn.sigmoid(y)[:, :, None, None]


def _make_params(key, C, Cr, dtype=jnp.float32):
    kw1, kb1, kw2, kb2 = jax.random.split(key, 4)
    w1 = jax.random.normal(kw1, (Cr, C), dtype=dtype) * 0.1
    b1 = jax.random.normal(kb1, (Cr,), dtype=dtype) * 0.1
    w2 = jax.random.normal(kw2, (C, Cr), dtype=dtype) * 0.1
    b2 = jax.random.normal(kb2, (C,), dtype=dtype) * 0.1
    return w1, b1, w2, b2


if __name__ == "__main__":
    key = jax.random.PRNGKey(0)
    k1, k2, k3, k4 = jax.random.split(key, 4)

    # --- Case 1: small shapes matching the module (channels=4, ratio=2) ---
    N, C, H, W = 2, 4, 16, 16
    Cr = C // 2
    x = jax.random.normal(k1, (N, C, H, W), dtype=jnp.float32)
    w1, b1, w2, b2 = _make_params(k2, C, Cr)

    out = se_weight_module(x, w1, b1, w2, b2)
    jax.block_until_ready(out)
    ref = se_weight_ref(x, w1, b1, w2, b2)
    assert out.shape == (N, C, 1, 1), out.shape
    assert jnp.allclose(out, ref, atol=1e-5, rtol=1e-5), "case1 mismatch vs reference"

    # Same case, forcing a multi-step spatial reduction (thw=128 over HW=256).
    out_ms = se_weight_module(x, w1, b1, w2, b2, thw=128)
    jax.block_until_ready(out_ms)
    assert jnp.allclose(out_ms, ref, atol=1e-5, rtol=1e-5), "case1 multi-step mismatch"

    # --- Case 2: ragged N tail (10 with tn=8) and ragged HW tail (300 with thw=128) ---
    N2, C2, H2, W2 = 10, 8, 15, 20
    Cr2 = C2 // 4
    x2 = jax.random.normal(k3, (N2, C2, H2, W2), dtype=jnp.float32)
    w1b, b1b, w2b, b2b = _make_params(k4, C2, Cr2)

    out2 = se_weight_module(x2, w1b, b1b, w2b, b2b, thw=128)
    jax.block_until_ready(out2)
    ref2 = se_weight_ref(x2, w1b, b1b, w2b, b2b)
    assert out2.shape == (N2, C2, 1, 1), out2.shape
    assert jnp.allclose(out2, ref2, atol=1e-5, rtol=1e-5), "case2 mismatch vs reference"

    print("KERNEL_OK")
</pallas_src>

<mosaic_0001>
module attributes {stable_mosaic.version = 11 : i64} {
  func.func @se_weight_kernel(%arg0: i32, %arg1: i32, %arg2: memref<2x4x256xf32, #tpu.memory_space<vmem>>, %arg3: memref<4x2xf32, #tpu.memory_space<vmem>>, %arg4: memref<1x2xf32, #tpu.memory_space<vmem>>, %arg5: memref<2x4xf32, #tpu.memory_space<vmem>>, %arg6: memref<1x4xf32, #tpu.memory_space<vmem>>, %arg7: memref<2x4xf32, #tpu.memory_space<vmem>>, %arg8: memref<2x4xf32, #tpu.memory_space<vmem>>) attributes {dimension_semantics = [#tpu.dimension_semantics<parallel>, #tpu.dimension_semantics<arbitrary>], iteration_bounds = array<i64: 1, 1>, scalar_prefetch = 0 : i64, scratch_operands = 1 : i64, tpu.core_type = #tpu.core_type<tc>, window_params = [{transform_indices = @transform_0, window_bounds = array<i64: 2, 4, 256>}, {pipeline_mode = #tpu.pipeline_mode<synchronous>, transform_indices = @transform_1, window_bounds = array<i64: 4, 2>}, {pipeline_mode = #tpu.pipeline_mode<synchronous>, transform_indices = @transform_2, window_bounds = array<i64: 1, 2>}, {pipeline_mode = #tpu.pipeline_mode<synchronous>, transform_indices = @transform_3, window_bounds = array<i64: 2, 4>}, {pipeline_mode = #tpu.pipeline_mode<synchronous>, transform_indices = @transform_4, window_bounds = array<i64: 1, 4>}, {transform_indices = @transform_5, window_bounds = array<i64: 2, 4>}]} {
    %c0_i32 = arith.constant 0 : i32
    %0 = arith.cmpi eq, %arg1, %c0_i32 : i32
    %1 = arith.extui %0 : i1 to i32
    %c0_i32_0 = arith.constant 0 : i32
    %2 = arith.cmpi ne, %1, %c0_i32_0 : i32
    scf.if %2 {
      %cst_9 = arith.constant 0.000000e+00 : f32
      %11 = vector.broadcast %cst_9 : f32 to vector<2x4xf32>
      %c0_10 = arith.constant 0 : index
      %c0_11 = arith.constant 0 : index
      %12 = vector.load %arg8[%c0_10, %c0_11] : memref<2x4xf32, #tpu.memory_space<vmem>>, vector<2x4xf32>
      tpu.vector_store %arg8[%c0_10, %c0_11], %11 {strides = array<i32>} : memref<2x4xf32, #tpu.memory_space<vmem>>, vector<2x4xf32>,
    } else {
    }
    %c0 = arith.constant 0 : index
    %c0_1 = arith.constant 0 : index
    %3 = vector.load %arg8[%c0, %c0_1] : memref<2x4xf32, #tpu.memory_space<vmem>>, vector<2x4xf32>
    %c0_2 = arith.constant 0 : index
    %c0_3 = arith.constant 0 : index
    %c0_4 = arith.constant 0 : index
    %4 = vector.load %arg2[%c0_2, %c0_3, %c0_4] : memref<2x4x256xf32, #tpu.memory_space<vmem>>, vector<2x4x256xf32>
    %cst = arith.constant dense<0.000000e+00> : vector<2x4xf32>
    %5 = vector.multi_reduction <add>, %4, %cst [2] : vector<2x4x256xf32> to vector<2x4xf32>
    %6 = arith.addf %3, %5 : vector<2x4xf32>
    %c0_5 = arith.constant 0 : index
    %c0_6 = arith.constant 0 : index
    %7 = vector.load %arg8[%c0_5, %c0_6] : memref<2x4xf32, #tpu.memory_space<vmem>>, vector<2x4xf32>
    tpu.vector_store %arg8[%c0_5, %c0_6], %6 {strides = array<i32>} : memref<2x4xf32, #tpu.memory_space<vmem>>, vector<2x4xf32>,
    %c0_i32_7 = arith.constant 0 : i32
    %8 = arith.cmpi eq, %arg1, %c0_i32_7 : i32
    %9 = arith.extui %8 : i1 to i32
    %c0_i32_8 = arith.constant 0 : i32
    %10 = arith.cmpi ne, %9, %c0_i32_8 : i32
    scf.if %10 {
      %c0_9 = arith.constant 0 : index
      %c0_10 = arith.constant 0 : index
      %11 = vector.load %arg8[%c0_9, %c0_10] : memref<2x4xf32, #tpu.memory_space<vmem>>, vector<2x4xf32>
      %cst_11 = arith.constant 3.906250e-03 : f32
      %12 = vector.broadcast %cst_11 : f32 to vector<2x4xf32>
      %13 = arith.mulf %11, %12 : vector<2x4xf32>
      %c0_12 = arith.constant 0 : index
      %c0_13 = arith.constant 0 : index
      %14 = vector.load %arg3[%c0_12, %c0_13] : memref<4x2xf32, #tpu.memory_space<vmem>>, vector<4x2xf32>
      %cst_14 = arith.constant dense<0.000000e+00> : vector<2x2xf32>
      %15 = tpu.matmul %13, %14, %cst_14 {dimension_numbers = #tpu.dot_dimension_numbers<[1], [0], [0], [1], [0, 0, 1, 1], [], []>} : vector<2x4xf32>, vector<4x2xf32>, vector<2x2xf32> -> vector<2x2xf32>
      %c0_15 = arith.constant 0 : index
      %c0_16 = arith.constant 0 : index
      %16 = vector.load %arg4[%c0_15, %c0_16] : memref<1x2xf32, #tpu.memory_space<vmem>>, vector<1x2xf32>
      %17 = vector.broadcast %16 : vector<1x2xf32> to vector<2x2xf32>
      %18 = arith.addf %15, %17 : vector<2x2xf32>
      %cst_17 = arith.constant 0.000000e+00 : f32
      %19 = vector.broadcast %cst_17 : f32 to vector<2x2xf32>
      %20 = arith.maximumf %18, %19 : vector<2x2xf32>
      %c0_18 = arith.constant 0 : index
      %c0_19 = arith.constant 0 : index
      %21 = vector.load %arg5[%c0_18, %c0_19] : memref<2x4xf32, #tpu.memory_space<vmem>>, vector<2x4xf32>
      %cst_20 = arith.constant dense<0.000000e+00> : vector<2x4xf32>
      %22 = tpu.matmul %20, %21, %cst_20 {dimension_numbers = #tpu.dot_dimension_numbers<[1], [0], [0], [1], [0, 0, 1, 1], [], []>} : vector<2x2xf32>, vector<2x4xf32>, vector<2x4xf32> -> vector<2x4xf32>
      %c0_21 = arith.constant 0 : index
      %c0_22 = arith.constant 0 : index
      %23 = vector.load %arg6[%c0_21, %c0_22] : memref<1x4xf32, #tpu.memory_space<vmem>>, vector<1x4xf32>
      %24 = vector.broadcast %23 : vector<1x4xf32> to vector<2x4xf32>
      %25 = arith.addf %22, %24 : vector<2x4xf32>
      %26 = arith.negf %25 : vector<2x4xf32>
      %27 = math.exp %26 : vector<2x4xf32>
      %cst_23 = arith.constant 1.000000e+00 : f32
      %28 = vector.broadcast %cst_23 : f32 to vector<2x4xf32>
      %29 = arith.addf %28, %27 : vector<2x4xf32>
      %30 = arith.divf %28, %29 : vector<2x4xf32>
      %c0_24 = arith.constant 0 : index
      %c0_25 = arith.constant 0 : index
      %31 = vector.load %arg7[%c0_24, %c0_25] : memref<2x4xf32, #tpu.memory_space<vmem>>, vector<2x4xf32>
      tpu.vector_store %arg7[%c0_24, %c0_25], %30 {strides = array<i32>} : memref<2x4xf32, #tpu.memory_space<vmem>>, vector<2x4xf32>,
    } else {
    }
    return
  }
  func.func @transform_0(%arg0: i32, %arg1: i32) -> (i32, i32, i32) {
    %c0_i32 = arith.constant 0 : i32
    %c0_i32_0 = arith.constant 0 : i32
    return %arg0, %c0_i32, %arg1 : i32, i32, i32
  }
  func.func @transform_1(%arg0: i32, %arg1: i32) -> (i32, i32) {
    %c0_i32 = arith.constant 0 : i32
    %c0_i32_0 = arith.constant 0 : i32
    %c0_i32_1 = arith.constant 0 : i32
    return %c0_i32, %c0_i32_0 : i32, i32
  }
  func.func @transform_2(%arg0: i32, %arg1: i32) -> (i32, i32) {
    %c0_i32 = arith.constant 0 : i32
    %c0_i32_0 = arith.constant 0 : i32
    %c0_i32_1 = arith.constant 0 : i32
    return %c0_i32, %c0_i32_0 : i32, i32
  }
  func.func @transform_3(%arg0: i32, %arg1: i32) -> (i32, i32) {
    %c0_i32 = arith.constant 0 : i32
    %c0_i32_0 = arith.constant 0 : i32
    %c0_i32_1 = arith.constant 0 : i32
    return %c0_i32, %c0_i32_0 : i32, i32
  }
  func.func @transform_4(%arg0: i32, %arg1: i32) -> (i32, i32) {
    %c0_i32 = arith.constant 0 : i32
    %c0_i32_0 = arith.constant 0 : i32
    %c0_i32_1 = arith.constant 0 : i32
    return %c0_i32, %c0_i32_0 : i32, i32
  }
  func.func @transform_5(%arg0: i32, %arg1: i32) -> (i32, i32) {
    %c0_i32 = arith.constant 0 : i32
    %c0_i32_0 = arith.constant 0 : i32
    return %arg0, %c0_i32 : i32, i32
  }
}

</mosaic_0001>

<bundles_post_ra>
// kernel: tpu_custom_call.1
= control target key start
LH: loop header
LB: loop body
LE: loop exit
PB: predicated region body
PF: predicated region fallthrough
CT: control target
= control target key end

     0   :  { %10 = vsyncpa [#allocation4], 0  ;;  %s417_s0 = inlined_call_operand.hbm [shape: f32[2,4,256], index: 0, kind: input, shape index: {}]   ;;  %s418_s1 = inlined_call_operand.vmem [shape: f32[4,2], index: 1, kind: input, shape index: {}]   ;;  %s419_s2 = inlined_call_operand.vmem [shape: f32[1,2], index: 2, kind: input, shape index: {}]   ;;  %s420_s3 = inlined_call_operand.vmem [shape: f32[2,4], index: 3, kind: input, shape index: {}]   ;;  %s421_s4 = inlined_call_operand.vmem [shape: f32[1,4], index: 4, kind: input, shape index: {}]   ;;  %s422_s5 = inlined_call_operand.hbm [shape: f32[2,4], index: 5, kind: output, shape index: {}]  }
   0x1   :  { %11 = vsyncpa [#allocation5], 0  ;;  %s355_s18 = smov [#allocation3]  }
   0x2   :  { %s17_s19 = sshll.u32 %s355_s18, 4  ;;  %s18_s19 = int_to_ptr.vmem [resolvable:$true] %s17_s19 }
   0x3   :  { %s319_s20 = scalar_lea.vmem %s18_s19, 256  ;;  %p324_p1 = scmp.lt.s32.totalorder %s18_s19, %s18_s19 }
   0x4   :  { %p320_p0 = scmp.ne.s32.totalorder %s18_s19, %s319_s20  ;;  %p325_p2 = scmp.lt.s32.totalorder %s319_s20, %s319_s20 }
   0x6   :  { %p326_p3 = por %p325_p2, %p324_p1 }
   0x8   :  { %p327_p4 = pnand %p326_p3, %p320_p0 }
   0xa   :  { %330 = shalt.err (!%p327_p4)
}
   0xb   :  { %s356_s21 = smov 128   ;;  %s357_s22 = smov 8  }
   0xc   :  { %23 = dma.hbm_to_vmem [thread:$0]  %s417_s0, 256, %s18_s19, [#allocation4], %s356_s21, %s356_s21, %s357_s22  }
   0xd   :  { %351 = dma.done.wait [#allocation4], 256  }
   0xe   :  { %352 = vsyncadd [#allocation4], 4294967040  ;;  %vm50_vm0 = vcmask 1043456   ;;  %v42_v0 = vld [vmem:[#allocation3] sm:$0xff]  ;;  %v43_v1 = vld [vmem:[#allocation3 + $0x8] sm:$0xff]  ;;  %vm39_vm1 = vcmask 25600   ;;  %v63_v12 = vlaneseq }
   0xf   :  { %v46_v2 = vcombine.high %v42_v0, %v42_v0  ;;  %v51_v3 = vsel %vm50_vm0, %v42_v0, 0.0  ;;  %v47_v4 = vcombine.high %v43_v1, %v43_v1  ;;  %v56_v6 = vsel %vm50_vm0, %v43_v1, 0.0  ;;  %v84_v11 = vld [vmem:[%s418_s1] sm:$0xf] }
  0x10   :  { %v358_v10 = vmov 0.0   ;;  %vm359_vm2 = vmmov 0   ;;  %v64_v13 = vand.u32 127, %v63_v12  ;;  %v66_v14 = vshrl.u32 %v63_v12, 7  ;;  %v170_v25 = vld [vmem:[%s420_s3] sm:$0x3] }
  0x11   :  { %v52_v5 = vsel %vm50_vm0, %v46_v2, 0.0  ;;  %v57_v7 = vsel %vm50_vm0, %v47_v4, 0.0  ;;  %40 = vst.msk [vmem:[#allocation2] sm:$0x3] %vm39_vm1, %v358_v10  ;;  %289 = vmatprep.subr.mxu0 %v358_v10  ;;  %294 = vmatprep.subr.mxu1 %v358_v10  ;;  %vm73_vm3 = vcmask 1041409   ;;  %vm92_vm4 = vcmask 31744  }
  0x12   :  { %v53_v8 = vadd.f32 %v52_v5, %v51_v3  ;;  %v58_v9 = vadd.f32 %v57_v7, %v56_v6  ;;  %290 = vmatpush3.msk.msra.mxu0 %vm50_vm0, %v84_v11  ;;  %291 = vmatprep.mubr.msk.f32.mxu0 %vm359_vm2, %v358_v10  ;;  %v67_v16 = vsub.s32 %v64_v13, %v66_v14  ;;  %vm182_vm5 = vcmask 1041408   ;;  %v278_v26 = vld [vmem:[%s419_s2] ss:$0 sm:$0xff]  ;;  %s360_s3 = smov [#allocation6]  }
  0x13   :  { %296 = vmatprep.mubr.msk.f32.mxu1 %vm359_vm2, %v358_v10  ;;  %295 = vmatpush3.msk.msra.mxu1 %vm182_vm5, %v170_v25  ;;  %vm178_vm6 = vcmask 15360   ;;  %v281_v31 = vld [vmem:[%s421_s4] ss:$0 sm:$0xff]  ;;  %s269_s2 = sshll.u32 %s360_s3, 4  ;;  %s270_s2 = int_to_ptr.vmem [resolvable:$true] %s269_s2 }
  0x14   :  { %54 = vadd.xlane.f32.xlu0 %v53_v8  ;;  %s331_s6 = scalar_lea.vmem %s270_s2, 32  ;;  %p336_p6 = scmp.lt.s32.totalorder %s270_s2, %s270_s2 }
  0x15   :  { %p332_p5 = scmp.ne.s32.totalorder %s270_s2, %s331_s6  ;;  %p337_p7 = scmp.lt.s32.totalorder %s331_s6, %s331_s6 }
  0x17   :  { %p338_p8 = por %p337_p7, %p336_p6 }
  0x18   :  { %59 = vadd.xlane.f32.xlu0 %v58_v9  ;;  %v41_v20 = vld [vmem:[#allocation2] sm:$0x3] }
  0x19   :  { %p339_p9 = pnand %p338_p8, %p332_p5 }
  0x9d   :  { %v55_v15 = vpop.xlane.xlu0 %54 }
  0x9e   :  { %v68_v18 = vrot.slane %v55_v15, %v67_v16 }
  0xa1   :  { %v60_v17 = vpop.xlane.xlu0 %59 }
  0xa2   :  { %v72_v19 = vrot.slane %v60_v17, %v67_v16 }
  0xa4   :  { %v74_v21 = vsel %vm73_vm3, %v72_v19, %v68_v18 }
  0xa5   :  { %v76_v22 = vadd.f32 %v74_v21, %v41_v20 }
  0xa7   :  { %78 = vst.msk [vmem:[#allocation2] sm:$0x3] %vm39_vm1, %v76_v22 }
  0xae   :  { %v82_v23 = vld [vmem:[#allocation2] sm:$0x3] }
  0xaf   :  { %v83_v24 = vmul.f32 0.00390625, %v82_v23 }
  0xb1   :  { %292 = vmatmul.mubr.msk.f32.vlgmr.msra.gmra.mxu0 %vm92_vm4, %v83_v24 }
 0x171   :  { %v165_v27 = vpop.f32.mrf.mxu0 }
 0x172   :  { %v166_v28 = vadd.f32 %v278_v26, %v165_v27 }
 0x173   :  { %v293_v29 = vpop.f32.mrf.mxu0 }
 0x174   :  { %v169_v30 = vmax.f32 %v166_v28, 0.0 }
 0x176   :  { %297 = vmatmul.mubr.msk.f32.vlgmr.msra.gmra.mxu1 %vm178_vm6, %v169_v30 }
 0x236   :  { %v252_v32 = vpop.f32.mrf.mxu1 }
 0x237   :  { %v253_v33 = vadd.f32 %v281_v31, %v252_v32 }
 0x238   :  { %v298_v34 = vpop.f32.mrf.mxu1 }
 0x239   :  { %v284_v35 = vmul.f32 -1.442695, %v253_v33 }
 0x23b   :  { %307 = vpow2.f32 %v284_v35 }
 0x248   :  { %v308_v36 = vpop.eup %307 }
 0x249   :  { %v259_v37 = vadd.f32 1.0, %v308_v36 }
 0x24b   :  { %309 = vrcp.f32 %v259_v37 }
 0x258   :  { %v310_v38 = vpop.eup %309 }
 0x259   :  { %262 = vst.msk [vmem:[#allocation6] sm:$0x3] %vm39_vm1, %v310_v38 }
 0x25a   :  { %342 = shalt.err (!%p339_p9)
}
 0x25b   :  { %272 = dma.vmem_to_hbm [thread:$0]  %s270_s2, 32, %s422_s5, [#allocation5]  }
 0x25c   :  { %353 = dma.done.wait [#allocation5], 32  }
 0x25d   :  { %354 = vsyncadd [#allocation5], 4294967264 }
 0x25e   :  { %276 = vsyncpa [#allocation4], 1 }
 0x25f   :  { %277 = vsyncpa [#allocation5], 1 }

</bundles_post_ra>
